<compile_context>
chip_gen: v6e
topology: v6e:2x2x1
jax: 0.10.0
libtpu: 0.0.40
codegen_flags: <defaults>
</compile_context>

<pallas_src>
import functools

import jax
import jax.numpy as jnp
from jax.experimental import pallas as pl
from jax.experimental.pallas import tpu as pltpu


def _round_up(v, m):
    return ((v + m - 1) // m) * m


def _pick_batch_block(batch):
    """Sublane-aligned batch block when possible (enables multi-TC sharding)."""
    if batch % 8 != 0:
        return batch
    for cand in (64, 32, 16, 8):
        if batch % cand == 0:
            return min(cand, batch)
    return batch


def _ltc_kernel(x_ref,      # (Bb, Tt, I)  input chunk (batch-major)
                wih_ref,    # (I,  Hp)     folded: Wih.T * (1/tau)
                whh_ref,    # (Hp, Hp)     folded: Whh.T * (1/tau) + diag(1-1/tau)
                b_ref,      # (1,  Hp)     folded: (b_ih + b_hh) * (1/tau)
                wfc_ref,    # (Hp, Op)     fc.weight.T (zero padded)
                bfc_ref,    # (1,  Op)
                out_ref,    # (Bb, Op)
                hid_ref,    # (Bb, Hp)
                h_scr,      # VMEM (Bb, Hp) hidden state, persists across chunks
                *, chunk, seq_len):
    c = pl.program_id(1)
    ragged = (seq_len % chunk) != 0   # Python bool: only mask when needed

    @pl.when(c == 0)
    def _init():
        h_scr[...] = jnp.zeros_like(h_scr)

    bb, tt, in_dim = x_ref.shape
    hp = whh_ref.shape[0]

    # Hoisted input projection for the whole chunk: one large MXU matmul
    # instead of `chunk` tiny (Bb x I) matmuls on the serial critical path.
    x2 = x_ref[...].reshape(bb * tt, in_dim)                     # (Bb*Tt, I)
    u2 = jnp.dot(x2, wih_ref[...],
                 preferred_element_type=jnp.float32) + b_ref[...]
    u = u2.reshape(bb, tt, hp)                                   # (Bb, Tt, Hp)

    whh = whh_ref[...]
    h = h_scr[...]
    t0 = c * chunk

    # Serial recurrence: h <- u_t + h @ Whh_eff   (tau/bias already folded).
    # Static unroll gives the LLO scheduler full cross-step visibility.
    for t in range(chunk):
        h_new = u[:, t, :] + jnp.dot(h, whh,
                                     preferred_element_type=jnp.float32)
        if ragged:
            h = jnp.where(t0 + t < seq_len, h_new, h)
        else:
            h = h_new

    h_scr[...] = h

    @pl.when(c == pl.num_programs(1) - 1)
    def _finalize():
        hid_ref[...] = h
        out_ref[...] = (jnp.dot(h, wfc_ref[...],
                                preferred_element_type=jnp.float32)
                        + bfc_ref[...])


def ltc_network_forward(x, params, *, time_chunk=64):
    """x: (B, T, I) float32.  Returns (output (B, O), hidden (B, H))."""
    B, T, I = x.shape
    H = params["weight_hh"].shape[0]
    O = params["fc_weight"].shape[0]

    Hp = _round_up(H, 128)   # lane-dense hidden dim
    Op = _round_up(O, 128)   # lane-dense output dim (unmasked stores)

    # ---- fold tau and biases into the weights (once, f32, weight-sized) ----
    inv_tau = 1.0 / params["tau"].astype(jnp.float32)                     # (H,)
    wih_eff = params["weight_ih"].astype(jnp.float32).T * inv_tau[None, :]
    whh_eff = (params["weight_hh"].astype(jnp.float32).T * inv_tau[None, :]
               + jnp.diag(1.0 - inv_tau))
    b_eff = ((params["bias_ih"] + params["bias_hh"]).astype(jnp.float32)
             * inv_tau)[None, :]
    wfc_t = params["fc_weight"].astype(jnp.float32).T                     # (H, O)
    bfc = params["fc_bias"].astype(jnp.float32)[None, :]                  # (1, O)

    # ---- zero-pad H/O to 128 multiples (padded hidden columns stay zero) ----
    wih_p = jnp.zeros((I, Hp), jnp.float32).at[:, :H].set(wih_eff)
    whh_p = jnp.zeros((Hp, Hp), jnp.float32).at[:H, :H].set(whh_eff)
    b_p = jnp.zeros((1, Hp), jnp.float32).at[:, :H].set(b_eff)
    wfc_p = jnp.zeros((Hp, Op), jnp.float32).at[:H, :O].set(wfc_t)
    bfc_p = jnp.zeros((1, Op), jnp.float32).at[:, :O].set(bfc)

    # ---- tiling ----
    Bb = _pick_batch_block(B)
    nb = B // Bb
    Tt = T if T <= time_chunk else time_chunk
    if Tt % 8 != 0 and Bb > 1:
        Tt = max(8 * (Tt // 8), 8)          # keep the in-kernel flatten a clean retile
    n_chunks = -(-T // Tt)

    kernel = functools.partial(_ltc_kernel, chunk=Tt, seq_len=T)

    grid_spec = pltpu.PrefetchScalarGridSpec(
        num_scalar_prefetch=0,
        grid=(nb, n_chunks),
        in_specs=[
            pl.BlockSpec((Bb, Tt, I), lambda b, c: (b, c, 0)),   # x, streamed
            pl.BlockSpec((I, Hp), lambda b, c: (0, 0)),          # resident weights
            pl.BlockSpec((Hp, Hp), lambda b, c: (0, 0)),
            pl.BlockSpec((1, Hp), lambda b, c: (0, 0)),
            pl.BlockSpec((Hp, Op), lambda b, c: (0, 0)),
            pl.BlockSpec((1, Op), lambda b, c: (0, 0)),
        ],
        out_specs=(
            pl.BlockSpec((Bb, Op), lambda b, c: (b, 0)),
            pl.BlockSpec((Bb, Hp), lambda b, c: (b, 0)),
        ),
        scratch_shapes=[pltpu.VMEM((Bb, Hp), jnp.float32)],
    )

    flops = 2 * B * T * (I * Hp + Hp * Hp) + 2 * B * Hp * Op
    bytes_accessed = 4 * (B * T * I + I * Hp + Hp * Hp + Hp * Op
                          + B * (Hp + Op) + 2 * Hp + Op)

    out_p, hid_p = pl.pallas_call(
        kernel,
        out_shape=(jax.ShapeDtypeStruct((B, Op), jnp.float32),
                   jax.ShapeDtypeStruct((B, Hp), jnp.float32)),
        grid_spec=grid_spec,
        compiler_params=pltpu.CompilerParams(
            dimension_semantics=("parallel", "arbitrary"),
            vmem_limit_bytes=32 * 1024 * 1024,   # safe on v5e/v6e/v7x
        ),
        cost_estimate=pl.CostEstimate(flops=flops, transcendentals=0,
                                      bytes_accessed=bytes_accessed),
    )(x.astype(jnp.float32), wih_p, whh_p, b_p, wfc_p, bfc_p)

    return out_p[:, :O], hid_p[:, :H]


def init_params(key, input_size, hidden_size, output_size):
    """Deterministic synthetic init matching the PyTorch parameter shapes."""
    k1, k2, k3 = jax.random.split(key, 3)
    lim_ih = (6.0 / input_size) ** 0.5
    lim_hh = (6.0 / hidden_size) ** 0.5
    lim_fc = (1.0 / hidden_size) ** 0.5
    return {
        "weight_ih": jax.random.uniform(k1, (hidden_size, input_size),
                                        jnp.float32, -lim_ih, lim_ih),
        "bias_ih": jnp.zeros((hidden_size,), jnp.float32),
        "weight_hh": jax.random.uniform(k2, (hidden_size, hidden_size),
                                        jnp.float32, -lim_hh, lim_hh),
        "bias_hh": jnp.zeros((hidden_size,), jnp.float32),
        "tau": jnp.ones((hidden_size,), jnp.float32),
        "fc_weight": jax.random.uniform(k3, (output_size, hidden_size),
                                        jnp.float32, -lim_fc, lim_fc),
        "fc_bias": jnp.zeros((output_size,), jnp.float32),
    }


def ltc_network_ref(x, params):
    """Pure-JAX reference mirroring the PyTorch forward (for verification)."""
    B, T, _ = x.shape
    H = params["weight_hh"].shape[0]
    h = jnp.zeros((B, H), jnp.float32)
    for t in range(T):
        pre = (x[:, t, :] @ params["weight_ih"].T + params["bias_ih"]
               + h @ params["weight_hh"].T + params["bias_hh"])
        dh = (pre - h) / params["tau"]
        h = h + dh
    out = h @ params["fc_weight"].T + params["fc_bias"]
    return out, h


if __name__ == "__main__":
    B, T, I, H, O = 2, 8, 4, 32, 8
    key = jax.random.PRNGKey(0)
    kx, kp = jax.random.split(key)
    x = jax.random.normal(kx, (B, T, I), jnp.float32)
    params = init_params(kp, I, H, O)

    out, hidden = ltc_network_forward(x, params)
    jax.block_until_ready((out, hidden))

    out_ref, hidden_ref = ltc_network_ref(x, params)
    assert jnp.allclose(out, out_ref, atol=1e-4, rtol=1e-4), "output mismatch"
    assert jnp.allclose(hidden, hidden_ref, atol=1e-4, rtol=1e-4), "hidden mismatch"

    print("KERNEL_OK")
</pallas_src>

<mosaic_0001>
module attributes {stable_mosaic.version = 11 : i64} {
  func.func @_ltc_kernel(%arg0: i32, %arg1: i32, %arg2: memref<2x8x4xf32, #tpu.memory_space<vmem>>, %arg3: memref<4x128xf32, #tpu.memory_space<vmem>>, %arg4: memref<128x128xf32, #tpu.memory_space<vmem>>, %arg5: memref<1x128xf32, #tpu.memory_space<vmem>>, %arg6: memref<128x128xf32, #tpu.memory_space<vmem>>, %arg7: memref<1x128xf32, #tpu.memory_space<vmem>>, %arg8: memref<2x128xf32, #tpu.memory_space<vmem>>, %arg9: memref<2x128xf32, #tpu.memory_space<vmem>>, %arg10: memref<2x128xf32, #tpu.memory_space<vmem>>) attributes {dimension_semantics = [#tpu.dimension_semantics<parallel>, #tpu.dimension_semantics<arbitrary>], iteration_bounds = array<i64: 1, 1>, scalar_prefetch = 0 : i64, scratch_operands = 1 : i64, tpu.core_type = #tpu.core_type<tc>, window_params = [{transform_indices = @transform_0, window_bounds = array<i64: 2, 8, 4>}, {pipeline_mode = #tpu.pipeline_mode<synchronous>, transform_indices = @transform_1, window_bounds = array<i64: 4, 128>}, {pipeline_mode = #tpu.pipeline_mode<synchronous>, transform_indices = @transform_2, window_bounds = array<i64: 128, 128>}, {pipeline_mode = #tpu.pipeline_mode<synchronous>, transform_indices = @transform_3, window_bounds = array<i64: 1, 128>}, {pipeline_mode = #tpu.pipeline_mode<synchronous>, transform_indices = @transform_4, window_bounds = array<i64: 128, 128>}, {pipeline_mode = #tpu.pipeline_mode<synchronous>, transform_indices = @transform_5, window_bounds = array<i64: 1, 128>}, {transform_indices = @transform_6, window_bounds = array<i64: 2, 128>}, {transform_indices = @transform_7, window_bounds = array<i64: 2, 128>}]} {
    %c0_i32 = arith.constant 0 : i32
    %0 = arith.cmpi eq, %arg1, %c0_i32 : i32
    %1 = arith.extui %0 : i1 to i32
    %c0_i32_0 = arith.constant 0 : i32
    %2 = arith.cmpi ne, %1, %c0_i32_0 : i32
    scf.if %2 {
      %cst_23 = arith.constant 0.000000e+00 : f32
      %49 = vector.broadcast %cst_23 : f32 to vector<2x128xf32>
      %c0_24 = arith.constant 0 : index
      %c0_25 = arith.constant 0 : index
      %50 = vector.load %arg10[%c0_24, %c0_25] : memref<2x128xf32, #tpu.memory_space<vmem>>, vector<2x128xf32>
      tpu.vector_store %arg10[%c0_24, %c0_25], %49 {strides = array<i32>} : memref<2x128xf32, #tpu.memory_space<vmem>>, vector<2x128xf32>,
    } else {
    }
    %c0 = arith.constant 0 : index
    %c0_1 = arith.constant 0 : index
    %c0_2 = arith.constant 0 : index
    %3 = vector.load %arg2[%c0, %c0_1, %c0_2] : memref<2x8x4xf32, #tpu.memory_space<vmem>>, vector<2x8x4xf32>
    %4 = vector.shape_cast %3 : vector<2x8x4xf32> to vector<16x4xf32>
    %c0_3 = arith.constant 0 : index
    %c0_4 = arith.constant 0 : index
    %5 = vector.load %arg3[%c0_3, %c0_4] : memref<4x128xf32, #tpu.memory_space<vmem>>, vector<4x128xf32>
    %cst = arith.constant dense<0.000000e+00> : vector<16x128xf32>
    %6 = tpu.matmul %4, %5, %cst {dimension_numbers = #tpu.dot_dimension_numbers<[1], [0], [0], [1], [0, 0, 1, 1], [], []>} : vector<16x4xf32>, vector<4x128xf32>, vector<16x128xf32> -> vector<16x128xf32>
    %c0_5 = arith.constant 0 : index
    %c0_6 = arith.constant 0 : index
    %7 = vector.load %arg5[%c0_5, %c0_6] : memref<1x128xf32, #tpu.memory_space<vmem>>, vector<1x128xf32>
    %8 = vector.broadcast %7 : vector<1x128xf32> to vector<16x128xf32>
    %9 = arith.addf %6, %8 : vector<16x128xf32>
    %10 = vector.shape_cast %9 : vector<16x128xf32> to vector<2x8x128xf32>
    %c0_7 = arith.constant 0 : index
    %c0_8 = arith.constant 0 : index
    %11 = vector.load %arg4[%c0_7, %c0_8] : memref<128x128xf32, #tpu.memory_space<vmem>>, vector<128x128xf32>
    %c0_9 = arith.constant 0 : index
    %c0_10 = arith.constant 0 : index
    %12 = vector.load %arg10[%c0_9, %c0_10] : memref<2x128xf32, #tpu.memory_space<vmem>>, vector<2x128xf32>
    %13 = vector.extract_strided_slice %10 {offsets = [0, 0, 0], sizes = [2, 1, 128], strides = [1, 1, 1]} : vector<2x8x128xf32> to vector<2x1x128xf32>
    %14 = vector.shape_cast %13 : vector<2x1x128xf32> to vector<2x128xf32>
    %cst_11 = arith.constant dense<0.000000e+00> : vector<2x128xf32>
    %15 = tpu.matmul %12, %11, %cst_11 {dimension_numbers = #tpu.dot_dimension_numbers<[1], [0], [0], [1], [0, 0, 1, 1], [], []>} : vector<2x128xf32>, vector<128x128xf32>, vector<2x128xf32> -> vector<2x128xf32>
    %16 = arith.addf %14, %15 : vector<2x128xf32>
    %17 = vector.extract_strided_slice %10 {offsets = [0, 1, 0], sizes = [2, 1, 128], strides = [1, 1, 1]} : vector<2x8x128xf32> to vector<2x1x128xf32>
    %18 = vector.shape_cast %17 : vector<2x1x128xf32> to vector<2x128xf32>
    %cst_12 = arith.constant dense<0.000000e+00> : vector<2x128xf32>
    %19 = tpu.matmul %16, %11, %cst_12 {dimension_numbers = #tpu.dot_dimension_numbers<[1], [0], [0], [1], [0, 0, 1, 1], [], []>} : vector<2x128xf32>, vector<128x128xf32>, vector<2x128xf32> -> vector<2x128xf32>
    %20 = arith.addf %18, %19 : vector<2x128xf32>
    %21 = vector.extract_strided_slice %10 {offsets = [0, 2, 0], sizes = [2, 1, 128], strides = [1, 1, 1]} : vector<2x8x128xf32> to vector<2x1x128xf32>
    %22 = vector.shape_cast %21 : vector<2x1x128xf32> to vector<2x128xf32>
    %cst_13 = arith.constant dense<0.000000e+00> : vector<2x128xf32>
    %23 = tpu.matmul %20, %11, %cst_13 {dimension_numbers = #tpu.dot_dimension_numbers<[1], [0], [0], [1], [0, 0, 1, 1], [], []>} : vector<2x128xf32>, vector<128x128xf32>, vector<2x128xf32> -> vector<2x128xf32>
    %24 = arith.addf %22, %23 : vector<2x128xf32>
    %25 = vector.extract_strided_slice %10 {offsets = [0, 3, 0], sizes = [2, 1, 128], strides = [1, 1, 1]} : vector<2x8x128xf32> to vector<2x1x128xf32>
    %26 = vector.shape_cast %25 : vector<2x1x128xf32> to vector<2x128xf32>
    %cst_14 = arith.constant dense<0.000000e+00> : vector<2x128xf32>
    %27 = tpu.matmul %24, %11, %cst_14 {dimension_numbers = #tpu.dot_dimension_numbers<[1], [0], [0], [1], [0, 0, 1, 1], [], []>} : vector<2x128xf32>, vector<128x128xf32>, vector<2x128xf32> -> vector<2x128xf32>
    %28 = arith.addf %26, %27 : vector<2x128xf32>
    %29 = vector.extract_strided_slice %10 {offsets = [0, 4, 0], sizes = [2, 1, 128], strides = [1, 1, 1]} : vector<2x8x128xf32> to vector<2x1x128xf32>
    %30 = vector.shape_cast %29 : vector<2x1x128xf32> to vector<2x128xf32>
    %cst_15 = arith.constant dense<0.000000e+00> : vector<2x128xf32>
    %31 = tpu.matmul %28, %11, %cst_15 {dimension_numbers = #tpu.dot_dimension_numbers<[1], [0], [0], [1], [0, 0, 1, 1], [], []>} : vector<2x128xf32>, vector<128x128xf32>, vector<2x128xf32> -> vector<2x128xf32>
    %32 = arith.addf %30, %31 : vector<2x128xf32>
    %33 = vector.extract_strided_slice %10 {offsets = [0, 5, 0], sizes = [2, 1, 128], strides = [1, 1, 1]} : vector<2x8x128xf32> to vector<2x1x128xf32>
    %34 = vector.shape_cast %33 : vector<2x1x128xf32> to vector<2x128xf32>
    %cst_16 = arith.constant dense<0.000000e+00> : vector<2x128xf32>
    %35 = tpu.matmul %32, %11, %cst_16 {dimension_numbers = #tpu.dot_dimension_numbers<[1], [0], [0], [1], [0, 0, 1, 1], [], []>} : vector<2x128xf32>, vector<128x128xf32>, vector<2x128xf32> -> vector<2x128xf32>
    %36 = arith.addf %34, %35 : vector<2x128xf32>
    %37 = vector.extract_strided_slice %10 {offsets = [0, 6, 0], sizes = [2, 1, 128], strides = [1, 1, 1]} : vector<2x8x128xf32> to vector<2x1x128xf32>
    %38 = vector.shape_cast %37 : vector<2x1x128xf32> to vector<2x128xf32>
    %cst_17 = arith.constant dense<0.000000e+00> : vector<2x128xf32>
    %39 = tpu.matmul %36, %11, %cst_17 {dimension_numbers = #tpu.dot_dimension_numbers<[1], [0], [0], [1], [0, 0, 1, 1], [], []>} : vector<2x128xf32>, vector<128x128xf32>, vector<2x128xf32> -> vector<2x128xf32>
    %40 = arith.addf %38, %39 : vector<2x128xf32>
    %41 = vector.extract_strided_slice %10 {offsets = [0, 7, 0], sizes = [2, 1, 128], strides = [1, 1, 1]} : vector<2x8x128xf32> to vector<2x1x128xf32>
    %42 = vector.shape_cast %41 : vector<2x1x128xf32> to vector<2x128xf32>
    %cst_18 = arith.constant dense<0.000000e+00> : vector<2x128xf32>
    %43 = tpu.matmul %40, %11, %cst_18 {dimension_numbers = #tpu.dot_dimension_numbers<[1], [0], [0], [1], [0, 0, 1, 1], [], []>} : vector<2x128xf32>, vector<128x128xf32>, vector<2x128xf32> -> vector<2x128xf32>
    %44 = arith.addf %42, %43 : vector<2x128xf32>
    %c0_19 = arith.constant 0 : index
    %c0_20 = arith.constant 0 : index
    %45 = vector.load %arg10[%c0_19, %c0_20] : memref<2x128xf32, #tpu.memory_space<vmem>>, vector<2x128xf32>
    tpu.vector_store %arg10[%c0_19, %c0_20], %44 {strides = array<i32>} : memref<2x128xf32, #tpu.memory_space<vmem>>, vector<2x128xf32>,
    %c0_i32_21 = arith.constant 0 : i32
    %46 = arith.cmpi eq, %arg1, %c0_i32_21 : i32
    %47 = arith.extui %46 : i1 to i32
    %c0_i32_22 = arith.constant 0 : i32
    %48 = arith.cmpi ne, %47, %c0_i32_22 : i32
    scf.if %48 {
      %c0_23 = arith.constant 0 : index
      %c0_24 = arith.constant 0 : index
      %49 = vector.load %arg9[%c0_23, %c0_24] : memref<2x128xf32, #tpu.memory_space<vmem>>, vector<2x128xf32>
      tpu.vector_store %arg9[%c0_23, %c0_24], %44 {strides = array<i32>} : memref<2x128xf32, #tpu.memory_space<vmem>>, vector<2x128xf32>,
      %c0_25 = arith.constant 0 : index
      %c0_26 = arith.constant 0 : index
      %50 = vector.load %arg6[%c0_25, %c0_26] : memref<128x128xf32, #tpu.memory_space<vmem>>, vector<128x128xf32>
      %cst_27 = arith.constant dense<0.000000e+00> : vector<2x128xf32>
      %51 = tpu.matmul %44, %50, %cst_27 {dimension_numbers = #tpu.dot_dimension_numbers<[1], [0], [0], [1], [0, 0, 1, 1], [], []>} : vector<2x128xf32>, vector<128x128xf32>, vector<2x128xf32> -> vector<2x128xf32>
      %c0_28 = arith.constant 0 : index
      %c0_29 = arith.constant 0 : index
      %52 = vector.load %arg7[%c0_28, %c0_29] : memref<1x128xf32, #tpu.memory_space<vmem>>, vector<1x128xf32>
      %53 = vector.broadcast %52 : vector<1x128xf32> to vector<2x128xf32>
      %54 = arith.addf %51, %53 : vector<2x128xf32>
      %c0_30 = arith.constant 0 : index
      %c0_31 = arith.constant 0 : index
      %55 = vector.load %arg8[%c0_30, %c0_31] : memref<2x128xf32, #tpu.memory_space<vmem>>, vector<2x128xf32>
      tpu.vector_store %arg8[%c0_30, %c0_31], %54 {strides = array<i32>} : memref<2x128xf32, #tpu.memory_space<vmem>>, vector<2x128xf32>,
    } else {
    }
    return
  }
  func.func @transform_0(%arg0: i32, %arg1: i32) -> (i32, i32, i32) {
    %c0_i32 = arith.constant 0 : i32
    %c0_i32_0 = arith.constant 0 : i32
    return %arg0, %arg1, %c0_i32 : i32, i32, i32
  }
  func.func @transform_1(%arg0: i32, %arg1: i32) -> (i32, i32) {
    %c0_i32 = arith.constant 0 : i32
    %c0_i32_0 = arith.constant 0 : i32
    %c0_i32_1 = arith.constant 0 : i32
    return %c0_i32, %c0_i32_0 : i32, i32
  }
  func.func @transform_2(%arg0: i32, %arg1: i32) -> (i32, i32) {
    %c0_i32 = arith.constant 0 : i32
    %c0_i32_0 = arith.constant 0 : i32
    %c0_i32_1 = arith.constant 0 : i32
    return %c0_i32, %c0_i32_0 : i32, i32
  }
  func.func @transform_3(%arg0: i32, %arg1: i32) -> (i32, i32) {
    %c0_i32 = arith.constant 0 : i32
    %c0_i32_0 = arith.constant 0 : i32
    %c0_i32_1 = arith.constant 0 : i32
    return %c0_i32, %c0_i32_0 : i32, i32
  }
  func.func @transform_4(%arg0: i32, %arg1: i32) -> (i32, i32) {
    %c0_i32 = arith.constant 0 : i32
    %c0_i32_0 = arith.constant 0 : i32
    %c0_i32_1 = arith.constant 0 : i32
    return %c0_i32, %c0_i32_0 : i32, i32
  }
  func.func @transform_5(%arg0: i32, %arg1: i32) -> (i32, i32) {
    %c0_i32 = arith.constant 0 : i32
    %c0_i32_0 = arith.constant 0 : i32
    %c0_i32_1 = arith.constant 0 : i32
    return %c0_i32, %c0_i32_0 : i32, i32
  }
  func.func @transform_6(%arg0: i32, %arg1: i32) -> (i32, i32) {
    %c0_i32 = arith.constant 0 : i32
    %c0_i32_0 = arith.constant 0 : i32
    return %arg0, %c0_i32 : i32, i32
  }
  func.func @transform_7(%arg0: i32, %arg1: i32) -> (i32, i32) {
    %c0_i32 = arith.constant 0 : i32
    %c0_i32_0 = arith.constant 0 : i32
    return %arg0, %c0_i32 : i32, i32
  }
}

</mosaic_0001>

<bundles_post_ra>
// kernel: tpu_custom_call.1
= control target key start
LH: loop header
LB: loop body
LE: loop exit
PB: predicated region body
PF: predicated region fallthrough
CT: control target
= control target key end

     0   :  { %13 = vsyncpa [#allocation4], 0  ;;  %s1971_s0 = inlined_call_operand.vmem [shape: f32[2,8,4], index: 0, kind: input, shape index: {}]   ;;  %s1972_s1 = inlined_call_operand.vmem [shape: f32[4,128], index: 1, kind: input, shape index: {}]   ;;  %s1973_s2 = inlined_call_operand.hbm [shape: f32[128,128], index: 2, kind: input, shape index: {}]   ;;  %s1974_s3 = inlined_call_operand.vmem [shape: f32[1,128], index: 3, kind: input, shape index: {}]   ;;  %s1975_s4 = inlined_call_operand.hbm [shape: f32[128,128], index: 4, kind: input, shape index: {}]   ;;  %s1976_s5 = inlined_call_operand.vmem [shape: f32[1,128], index: 5, kind: input, shape index: {}]   ;;  %s1977_s6 = inlined_call_operand.hbm [shape: f32[2,128], index: 6, kind: output, shape index: {0}]   ;;  %s1978_s7 = inlined_call_operand.hbm [shape: f32[2,128], index: 7, kind: output, shape index: {1}]  }
   0x1   :  { %14 = vsyncpa [#allocation7], 0 }
   0x2   :  { %15 = vsyncpa [#allocation5], 0 }
   0x3   :  { %16 = vsyncpa [#allocation10], 0  ;;  %s1545_s24 = smov [#allocation3]  }
   0x4   :  { %s26_s25 = sshll.u32 %s1545_s24, 4  ;;  %s27_s25 = int_to_ptr.vmem [resolvable:$true] %s26_s25 }
   0x5   :  { %s1465_s26 = scalar_lea.vmem %s27_s25, 2048  ;;  %p1470_p1 = scmp.lt.s32.totalorder %s27_s25, %s27_s25 }
   0x6   :  { %p1466_p0 = scmp.ne.s32.totalorder %s27_s25, %s1465_s26  ;;  %p1471_p2 = scmp.lt.s32.totalorder %s1465_s26, %s1465_s26 }
   0x8   :  { %p1472_p3 = por %p1471_p2, %p1470_p1 }
   0xa   :  { %p1473_p4 = pnand %p1472_p3, %p1466_p0 }
   0xc   :  { %1476 = shalt.err (!%p1473_p4)
}
   0xd   :  { %s1546_s27 = smov 128   ;;  %s1547_s28 = smov 8  }
   0xe   :  { %32 = dma.hbm_to_vmem [thread:$0]  %s1973_s2, 2048, %s27_s25, [#allocation4], %s1546_s27, %s1546_s27, %s1547_s28  }
   0xf   :  { %s1548_s8 = smov [#allocation6]  }
  0x10   :  { %s40_s9 = sshll.u32 %s1548_s8, 4  ;;  %s41_s9 = int_to_ptr.vmem [resolvable:$true] %s40_s9 }
  0x11   :  { %s1485_s10 = scalar_lea.vmem %s41_s9, 2048  ;;  %p1490_p6 = scmp.lt.s32.totalorder %s41_s9, %s41_s9 }
  0x12   :  { %p1486_p5 = scmp.ne.s32.totalorder %s41_s9, %s1485_s10  ;;  %p1491_p7 = scmp.lt.s32.totalorder %s1485_s10, %s1485_s10 }
  0x14   :  { %p1492_p8 = por %p1491_p7, %p1490_p6 }
  0x16   :  { %p1493_p9 = pnand %p1492_p8, %p1486_p5 }
  0x18   :  { %1496 = shalt.err (!%p1493_p9)
}
  0x19   :  { %46 = dma.hbm_to_vmem [thread:$0]  %s1975_s4, 2048, %s41_s9, [#allocation7], %s1546_s27, %s1546_s27, %s1547_s28  }
  0x1a   :  { %1537 = dma.done.wait [#allocation4], 2048  }
  0x1b   :  { %1538 = vsyncadd [#allocation4], 4294965248 }
  0x1c   :  { %1539 = dma.done.wait [#allocation7], 2048  }
  0x1d   :  { %1540 = vsyncadd [#allocation7], 4294965248  ;;  %v1549_v0 = vmov 0.0   ;;  %vm1550_vm0 = vmmov 0   ;;  %v1603_v1 = vld [vmem:[#allocation3 + $0x78] sm:$0xff]  ;;  %v1605_v2 = vld [vmem:[#allocation3 + $0x70] sm:$0xff] }
  0x1e   :  { %1134 = vmatprep.subr.mxu1 %v1549_v0  ;;  %59 = vst [vmem:[#allocation2] sm:$0x3] %v1549_v0  ;;  %1166 = vmatprep.mubr.msk.f32.mxu1 %vm1550_vm0, %v1549_v0  ;;  %v1609_v3 = vld [vmem:[#allocation3 + $0x68] sm:$0xff]  ;;  %vm77_vm1 = vcmask 1043456   ;;  %v1613_v4 = vld [vmem:[#allocation3 + $0x60] sm:$0xff]  ;;  %vm70_vm2 = vcmask 31744  }
  0x1f   :  { %1135 = vmatpush3.msra.mxu1 %v1603_v1  ;;  %v62_v5 = vld [vmem:[%s1972_s1] sm:$0xf]  ;;  %v61_v7 = vld [vmem:[%s1971_s0 + $0x8] sm:$0xff]  ;;  %v1630_v9 = vld [vmem:[#allocation3 + $0x50] sm:$0xff]  ;;  %vm252_vm3 = vcmask 1041409  }
  0x20   :  { %1136 = vmatprep.subr.mxu1 %v1549_v0  ;;  %v60_v6 = vld [vmem:[%s1971_s0] sm:$0xff]  ;;  %1129 = vmatprep.subr.msk.mxu0 %vm77_vm1, %v62_v5  ;;  %v1635_v10 = vld [vmem:[#allocation3 + $0x48] sm:$0xff]  ;;  %v1653_v13 = vld [vmem:[#allocation3 + $0x30] sm:$0xff] }
  0x21   :  { %1137 = vmatpush3.msra.mxu1 %v1605_v2  ;;  %v1626_v8 = vld [vmem:[#allocation3 + $0x58] sm:$0xff]  ;;  %1130 = vmatpush3.msk.msra.mxu0 %vm77_vm1, %v62_v5  ;;  %v1641_v11 = vld [vmem:[#allocation3 + $0x40] sm:$0xff]  ;;  %v1659_v14 = vld [vmem:[#allocation3 + $0x28] sm:$0xff] }
  0x22   :  { %1138 = vmatprep.subr.mxu1 %v1549_v0  ;;  %1131 = vmatprep.mubr.msk.f32.mxu0 %vm70_vm2, %v60_v6  ;;  %v1647_v12 = vld [vmem:[#allocation3 + $0x38] sm:$0xff]  ;;  %v1665_v15 = vld [vmem:[#allocation3 + $0x20] sm:$0xff]  ;;  %v1677_v17 = vld [vmem:[#allocation3 + $0x10] sm:$0xff] }
  0x23   :  { %1139 = vmatpush3.msra.mxu1 %v1609_v3  ;;  %1132 = vmatmul.mubr.msk.f32.vlgmr.msra.gmra.mxu0 %vm70_vm2, %v61_v7  ;;  %v1671_v16 = vld [vmem:[#allocation3 + $0x18] sm:$0xff]  ;;  %v1683_v18 = vld [vmem:[#allocation3 + $0x8] sm:$0xff]  ;;  %v1689_v19 = vld [vmem:[#allocation3] sm:$0xff] }
  0x24   :  { %1140 = vmatprep.subr.mxu1 %v1549_v0  ;;  %1169 = vmatprep.subr.mxu0 %v1549_v0  ;;  %v968_v22 = vld [vmem:[%s1974_s3] ss:$0 sm:$0xff]  ;;  %s1551_s3 = smov [#allocation9]  }
  0x25   :  { %1141 = vmatpush3.msra.mxu1 %v1613_v4  ;;  %1170 = vmatpush3.msra.mxu0 %v1603_v1  ;;  %v172_v20 = vld [vmem:[#allocation2] sm:$0x3]  ;;  %s954_s17 = sshll.u32 %s1551_s3, 4  ;;  %s955_s17 = int_to_ptr.vmem [resolvable:$true] %s954_s17 }
  0x26   :  { %1142 = vmatprep.subr.mxu1 %v1549_v0  ;;  %1171 = vmatprep.subr.mxu0 %v1549_v0  ;;  %s1497_s18 = scalar_lea.vmem %s955_s17, 32  ;;  %p1502_p11 = scmp.lt.s32.totalorder %s955_s17, %s955_s17 }
  0x27   :  { %1143 = vmatpush3.msra.mxu1 %v1626_v8  ;;  %1172 = vmatpush3.msra.mxu0 %v1605_v2  ;;  %p1498_p10 = scmp.ne.s32.totalorder %s955_s17, %s1497_s18  ;;  %p1503_p12 = scmp.lt.s32.totalorder %s1497_s18, %s1497_s18 }
  0x28   :  { %1144 = vmatprep.subr.mxu1 %v1549_v0  ;;  %1173 = vmatprep.subr.mxu0 %v1549_v0 }
  0x29   :  { %1145 = vmatpush3.msra.mxu1 %v1630_v9  ;;  %1174 = vmatpush3.msra.mxu0 %v1609_v3  ;;  %p1504_p13 = por %p1503_p12, %p1502_p11 }
  0x2a   :  { %1146 = vmatprep.subr.mxu1 %v1549_v0  ;;  %1175 = vmatprep.subr.mxu0 %v1549_v0 }
  0x2b   :  { %1147 = vmatpush3.msra.mxu1 %v1635_v10  ;;  %1176 = vmatpush3.msra.mxu0 %v1613_v4  ;;  %p1505_p0 = pnand %p1504_p13, %p1498_p10 }
  0x2c   :  { %1148 = vmatprep.subr.mxu1 %v1549_v0  ;;  %1177 = vmatprep.subr.mxu0 %v1549_v0 }
  0x2d   :  { %1149 = vmatpush3.msra.mxu1 %v1641_v11  ;;  %1178 = vmatpush3.msra.mxu0 %v1626_v8 }
  0x2e   :  { %1150 = vmatprep.subr.mxu1 %v1549_v0  ;;  %1179 = vmatprep.subr.mxu0 %v1549_v0 }
  0x2f   :  { %1151 = vmatpush3.msra.mxu1 %v1647_v12  ;;  %1180 = vmatpush3.msra.mxu0 %v1630_v9 }
  0x30   :  { %1152 = vmatprep.subr.mxu1 %v1549_v0  ;;  %1181 = vmatprep.subr.mxu0 %v1549_v0 }
  0x31   :  { %1153 = vmatpush3.msra.mxu1 %v1653_v13  ;;  %1182 = vmatpush3.msra.mxu0 %v1635_v10 }
  0x32   :  { %1154 = vmatprep.subr.mxu1 %v1549_v0  ;;  %1183 = vmatprep.subr.mxu0 %v1549_v0 }
  0x33   :  { %1155 = vmatpush3.msra.mxu1 %v1659_v14  ;;  %1184 = vmatpush3.msra.mxu0 %v1641_v11 }
  0x34   :  { %1156 = vmatprep.subr.mxu1 %v1549_v0  ;;  %1185 = vmatprep.subr.mxu0 %v1549_v0 }
  0x35   :  { %1157 = vmatpush3.msra.mxu1 %v1665_v15  ;;  %1186 = vmatpush3.msra.mxu0 %v1647_v12 }
  0x36   :  { %1158 = vmatprep.subr.mxu1 %v1549_v0  ;;  %1187 = vmatprep.subr.mxu0 %v1549_v0 }
  0x37   :  { %1159 = vmatpush3.msra.mxu1 %v1671_v16  ;;  %1188 = vmatpush3.msra.mxu0 %v1653_v13 }
  0x38   :  { %1160 = vmatprep.subr.mxu1 %v1549_v0  ;;  %1189 = vmatprep.subr.mxu0 %v1549_v0 }
  0x39   :  { %1161 = vmatpush3.msra.mxu1 %v1677_v17  ;;  %1190 = vmatpush3.msra.mxu0 %v1659_v14 }
  0x3a   :  { %1162 = vmatprep.subr.mxu1 %v1549_v0  ;;  %1191 = vmatprep.subr.mxu0 %v1549_v0 }
  0x3b   :  { %1163 = vmatpush3.msra.mxu1 %v1683_v18  ;;  %1192 = vmatpush3.msra.mxu0 %v1665_v15 }
  0x3c   :  { %1164 = vmatprep.subr.mxu1 %v1549_v0  ;;  %1193 = vmatprep.subr.mxu0 %v1549_v0 }
  0x3d   :  { %1165 = vmatpush3.msra.mxu1 %v1689_v19  ;;  %1201 = vmatprep.mubr.msk.f32.mxu0 %vm1550_vm0, %v1549_v0 }
  0x3e   :  { %1167 = vmatmul.mubr.f32.vlgmr.msra.gmra.mxu1 %v172_v20  ;;  %1194 = vmatpush3.msra.mxu0 %v1671_v16  ;;  %v848_v20 = vld [vmem:[#allocation6 + $0x40] sm:$0xff] }
  0x3f   :  { %1204 = vmatprep.subr.mxu1 %v1549_v0  ;;  %1195 = vmatprep.subr.mxu0 %v1549_v0 }
  0x40   :  { %1205 = vmatpush3.msra.mxu1 %v1603_v1  ;;  %1196 = vmatpush3.msra.mxu0 %v1677_v17 }
  0x41   :  { %1206 = vmatprep.subr.mxu1 %v1549_v0  ;;  %1197 = vmatprep.subr.mxu0 %v1549_v0 }
  0x42   :  { %1207 = vmatpush3.msra.mxu1 %v1605_v2  ;;  %1198 = vmatpush3.msra.mxu0 %v1683_v18 }
  0x43   :  { %1208 = vmatprep.subr.mxu1 %v1549_v0  ;;  %1199 = vmatprep.subr.mxu0 %v1549_v0 }
  0x44   :  { %1209 = vmatpush3.msra.mxu1 %v1609_v3  ;;  %1200 = vmatpush3.msra.mxu0 %v1689_v19 }
  0x45   :  { %1210 = vmatprep.subr.mxu1 %v1549_v0  ;;  %1236 = vmatprep.mubr.msk.f32.mxu1 %vm1550_vm0, %v1549_v0 }
  0x46   :  { %1211 = vmatpush3.msra.mxu1 %v1613_v4  ;;  %1239 = vmatprep.subr.mxu0 %v1549_v0 }
  0x47   :  { %1212 = vmatprep.subr.mxu1 %v1549_v0 }
  0x48   :  { %1213 = vmatpush3.msra.mxu1 %v1626_v8 }
  0x49   :  { %1214 = vmatprep.subr.mxu1 %v1549_v0 }
  0x4a   :  { %1215 = vmatpush3.msra.mxu1 %v1630_v9 }
  0x4b   :  { %1216 = vmatprep.subr.mxu1 %v1549_v0 }
  0x4c   :  { %1217 = vmatpush3.msra.mxu1 %v1635_v10 }
  0x4d   :  { %1218 = vmatprep.subr.mxu1 %v1549_v0 }
  0x4e   :  { %1219 = vmatpush3.msra.mxu1 %v1641_v11 }
  0x4f   :  { %1220 = vmatprep.subr.mxu1 %v1549_v0 }
  0x50   :  { %1221 = vmatpush3.msra.mxu1 %v1647_v12 }
  0x51   :  { %1222 = vmatprep.subr.mxu1 %v1549_v0 }
  0x52   :  { %1223 = vmatpush3.msra.mxu1 %v1653_v13 }
  0x53   :  { %1224 = vmatprep.subr.mxu1 %v1549_v0 }
  0x54   :  { %1225 = vmatpush3.msra.mxu1 %v1659_v14 }
  0x55   :  { %1226 = vmatprep.subr.mxu1 %v1549_v0 }
  0x56   :  { %1227 = vmatpush3.msra.mxu1 %v1665_v15 }
  0x57   :  { %1228 = vmatprep.subr.mxu1 %v1549_v0 }
  0x58   :  { %1229 = vmatpush3.msra.mxu1 %v1671_v16 }
  0x59   :  { %1230 = vmatprep.subr.mxu1 %v1549_v0 }
  0x5a   :  { %1231 = vmatpush3.msra.mxu1 %v1677_v17 }
  0x5b   :  { %1232 = vmatprep.subr.mxu1 %v1549_v0 }
  0x5c   :  { %1233 = vmatpush3.msra.mxu1 %v1683_v18 }
  0x5d   :  { %1234 = vmatprep.subr.mxu1 %v1549_v0 }
  0x5e   :  { %1235 = vmatpush3.msra.mxu1 %v1689_v19 }
  0x5f   :  { %1274 = vmatprep.subr.mxu1 %v1549_v0 }
  0xe3   :  { %v1133_v21 = vpop.f32.mrf.mxu0 }
  0xe4   :  { %v1748_v24 = vadd.f32 %v1133_v21, %v968_v22  ;;  %v847_v21 = vld [vmem:[#allocation6 + $0x38] sm:$0xff] }
  0xe5   :  { %v147_v23 = vpop.f32.mrf.mxu0 }
  0xe6   :  { %v1750_v26 = vadd.f32 %v968_v22, %v147_v23  ;;  %v846_v22 = vld [vmem:[#allocation6 + $0x30] sm:$0xff]  ;;  %v845_v23 = vld [vmem:[#allocation6 + $0x28] sm:$0xff] }
  0xfe   :  { %v239_v25 = vpop.f32.mrf.mxu1 }
  0xff   :  { %v244_v27 = vrot.slane %v239_v25, 1  ;;  %v247_v30 = vadd.f32 %v239_v25, %v1750_v26  ;;  %v844_v25 = vld [vmem:[#allocation6 + $0x20] sm:$0xff] }
 0x100   :  { %v1168_v28 = vpop.f32.mrf.mxu1 }
 0x101   :  { %v248_v29 = vadd.f32 %v244_v27, %v1748_v24 }
 0x103   :  { %v251_v31 = vrot.slane %v248_v29, 7 }
 0x105   :  { %v253_v32 = vsel %vm252_vm3, %v251_v31, %v247_v30 }
 0x106   :  { %1202 = vmatmul.mubr.f32.vlgmr.msra.gmra.mxu0 %v253_v32 }
 0x107   :  { %1240 = vmatpush3.msra.mxu0 %v1603_v1  ;;  %1271 = vmatprep.mubr.msk.f32.mxu0 %vm1550_vm0, %v1549_v0 }
 0x108   :  { %1241 = vmatprep.subr.mxu0 %v1549_v0 }
 0x109   :  { %1242 = vmatpush3.msra.mxu0 %v1605_v2 }
 0x10a   :  { %1243 = vmatprep.subr.mxu0 %v1549_v0 }
 0x10b   :  { %1244 = vmatpush3.msra.mxu0 %v1609_v3 }
 0x10c   :  { %1245 = vmatprep.subr.mxu0 %v1549_v0 }
 0x10d   :  { %1246 = vmatpush3.msra.mxu0 %v1613_v4 }
 0x10e   :  { %1247 = vmatprep.subr.mxu0 %v1549_v0 }
 0x10f   :  { %1248 = vmatpush3.msra.mxu0 %v1626_v8 }
 0x110   :  { %1249 = vmatprep.subr.mxu0 %v1549_v0 }
 0x111   :  { %1250 = vmatpush3.msra.mxu0 %v1630_v9 }
 0x112   :  { %1251 = vmatprep.subr.mxu0 %v1549_v0 }
 0x113   :  { %1252 = vmatpush3.msra.mxu0 %v1635_v10 }
 0x114   :  { %1253 = vmatprep.subr.mxu0 %v1549_v0 }
 0x115   :  { %1254 = vmatpush3.msra.mxu0 %v1641_v11 }
 0x116   :  { %1255 = vmatprep.subr.mxu0 %v1549_v0 }
 0x117   :  { %1256 = vmatpush3.msra.mxu0 %v1647_v12 }
 0x118   :  { %1257 = vmatprep.subr.mxu0 %v1549_v0 }
 0x119   :  { %1258 = vmatpush3.msra.mxu0 %v1653_v13 }
 0x11a   :  { %1259 = vmatprep.subr.mxu0 %v1549_v0 }
 0x11b   :  { %1260 = vmatpush3.msra.mxu0 %v1659_v14 }
 0x11c   :  { %1261 = vmatprep.subr.mxu0 %v1549_v0 }
 0x11d   :  { %1262 = vmatpush3.msra.mxu0 %v1665_v15 }
 0x11e   :  { %1263 = vmatprep.subr.mxu0 %v1549_v0 }
 0x11f   :  { %1264 = vmatpush3.msra.mxu0 %v1671_v16 }
 0x120   :  { %1265 = vmatprep.subr.mxu0 %v1549_v0 }
 0x121   :  { %1266 = vmatpush3.msra.mxu0 %v1677_v17 }
 0x122   :  { %1267 = vmatprep.subr.mxu0 %v1549_v0 }
 0x123   :  { %1268 = vmatpush3.msra.mxu0 %v1683_v18 }
 0x124   :  { %1269 = vmatprep.subr.mxu0 %v1549_v0 }
 0x125   :  { %1270 = vmatpush3.msra.mxu0 %v1689_v19 }
 0x126   :  { %1309 = vmatprep.subr.mxu0 %v1549_v0 }
 0x1c6   :  { %v321_v33 = vpop.f32.mrf.mxu0 }
 0x1c7   :  { %v326_v34 = vrot.slane %v321_v33, 7  ;;  %v330_v37 = vadd.f32 %v321_v33, %v1748_v24 }
 0x1c8   :  { %v1203_v35 = vpop.f32.mrf.mxu0 }
 0x1c9   :  { %v329_v36 = vadd.f32 %v326_v34, %v1750_v26 }
 0x1cb   :  { %v333_v38 = vrot.slane %v329_v36, 1  ;;  %v843_v36 = vld [vmem:[#allocation6 + $0x18] sm:$0xff] }
 0x1cd   :  { %v334_v39 = vsel %vm252_vm3, %v330_v37, %v333_v38  ;;  %v842_v37 = vld [vmem:[#allocation6 + $0x10] sm:$0xff]  ;;  %v841_v38 = vld [vmem:[#allocation6 + $0x8] sm:$0xff] }
 0x1ce   :  { %1237 = vmatmul.mubr.f32.vlgmr.msra.gmra.mxu1 %v334_v39  ;;  %v840_v39 = vld [vmem:[#allocation6] sm:$0xff] }
 0x1cf   :  { %1275 = vmatpush3.msra.mxu1 %v1603_v1  ;;  %1306 = vmatprep.mubr.msk.f32.mxu1 %vm1550_vm0, %v1549_v0 }
 0x1d0   :  { %1276 = vmatprep.subr.mxu1 %v1549_v0 }
 0x1d1   :  { %1277 = vmatpush3.msra.mxu1 %v1605_v2 }
 0x1d2   :  { %1278 = vmatprep.subr.mxu1 %v1549_v0 }
 0x1d3   :  { %1279 = vmatpush3.msra.mxu1 %v1609_v3 }
 0x1d4   :  { %1280 = vmatprep.subr.mxu1 %v1549_v0 }
 0x1d5   :  { %1281 = vmatpush3.msra.mxu1 %v1613_v4 }
 0x1d6   :  { %1282 = vmatprep.subr.mxu1 %v1549_v0 }
 0x1d7   :  { %1283 = vmatpush3.msra.mxu1 %v1626_v8 }
 0x1d8   :  { %1284 = vmatprep.subr.mxu1 %v1549_v0 }
 0x1d9   :  { %1285 = vmatpush3.msra.mxu1 %v1630_v9 }
 0x1da   :  { %1286 = vmatprep.subr.mxu1 %v1549_v0 }
 0x1db   :  { %1287 = vmatpush3.msra.mxu1 %v1635_v10 }
 0x1dc   :  { %1288 = vmatprep.subr.mxu1 %v1549_v0 }
 0x1dd   :  { %1289 = vmatpush3.msra.mxu1 %v1641_v11 }
 0x1de   :  { %1290 = vmatprep.subr.mxu1 %v1549_v0 }
 0x1df   :  { %1291 = vmatpush3.msra.mxu1 %v1647_v12 }
 0x1e0   :  { %1292 = vmatprep.subr.mxu1 %v1549_v0 }
 0x1e1   :  { %1293 = vmatpush3.msra.mxu1 %v1653_v13 }
 0x1e2   :  { %1294 = vmatprep.subr.mxu1 %v1549_v0 }
 0x1e3   :  { %1295 = vmatpush3.msra.mxu1 %v1659_v14 }
 0x1e4   :  { %1296 = vmatprep.subr.mxu1 %v1549_v0 }
 0x1e5   :  { %1297 = vmatpush3.msra.mxu1 %v1665_v15 }
 0x1e6   :  { %1298 = vmatprep.subr.mxu1 %v1549_v0 }
 0x1e7   :  { %1299 = vmatpush3.msra.mxu1 %v1671_v16 }
 0x1e8   :  { %1300 = vmatprep.subr.mxu1 %v1549_v0 }
 0x1e9   :  { %1301 = vmatpush3.msra.mxu1 %v1677_v17 }
 0x1ea   :  { %1302 = vmatprep.subr.mxu1 %v1549_v0 }
 0x1eb   :  { %1303 = vmatpush3.msra.mxu1 %v1683_v18 }
 0x1ec   :  { %1304 = vmatprep.subr.mxu1 %v1549_v0 }
 0x1ed   :  { %1305 = vmatpush3.msra.mxu1 %v1689_v19 }
 0x1ee   :  { %1344 = vmatprep.subr.mxu1 %v1549_v0 }
 0x28e   :  { %v402_v40 = vpop.f32.mrf.mxu1 }
 0x28f   :  { %v407_v41 = vrot.slane %v402_v40, 6  ;;  %v408_v42 = vrot.slane %v402_v40, 7 }
 0x290   :  { %v1238_v43 = vpop.f32.mrf.mxu1 }
 0x291   :  { %v411_v44 = vadd.f32 %v407_v41, %v1750_v26  ;;  %v412_v45 = vadd.f32 %v408_v42, %v1748_v24 }
 0x293   :  { %v415_v46 = vrot.slane %v411_v44, 2  ;;  %v416_v47 = vrot.slane %v412_v45, 1 }
 0x295   :  { %v417_v48 = vsel %vm252_vm3, %v416_v47, %v415_v46 }
 0x296   :  { %1272 = vmatmul.mubr.f32.vlgmr.msra.gmra.mxu0 %v417_v48 }
 0x297   :  { %1310 = vmatpush3.msra.mxu0 %v1603_v1  ;;  %1341 = vmatprep.mubr.msk.f32.mxu0 %vm1550_vm0, %v1549_v0 }
 0x298   :  { %1311 = vmatprep.subr.mxu0 %v1549_v0 }
 0x299   :  { %1312 = vmatpush3.msra.mxu0 %v1605_v2 }
 0x29a   :  { %1313 = vmatprep.subr.mxu0 %v1549_v0 }
 0x29b   :  { %1314 = vmatpush3.msra.mxu0 %v1609_v3 }
 0x29c   :  { %1315 = vmatprep.subr.mxu0 %v1549_v0 }
 0x29d   :  { %1316 = vmatpush3.msra.mxu0 %v1613_v4 }
 0x29e   :  { %1317 = vmatprep.subr.mxu0 %v1549_v0 }
 0x29f   :  { %1318 = vmatpush3.msra.mxu0 %v1626_v8 }
 0x2a0   :  { %1319 = vmatprep.subr.mxu0 %v1549_v0 }
 0x2a1   :  { %1320 = vmatpush3.msra.mxu0 %v1630_v9 }
 0x2a2   :  { %1321 = vmatprep.subr.mxu0 %v1549_v0 }
 0x2a3   :  { %1322 = vmatpush3.msra.mxu0 %v1635_v10 }
 0x2a4   :  { %1323 = vmatprep.subr.mxu0 %v1549_v0 }
 0x2a5   :  { %1324 = vmatpush3.msra.mxu0 %v1641_v11 }
 0x2a6   :  { %1325 = vmatprep.subr.mxu0 %v1549_v0 }
 0x2a7   :  { %1326 = vmatpush3.msra.mxu0 %v1647_v12 }
 0x2a8   :  { %1327 = vmatprep.subr.mxu0 %v1549_v0 }
 0x2a9   :  { %1328 = vmatpush3.msra.mxu0 %v1653_v13 }
 0x2aa   :  { %1329 = vmatprep.subr.mxu0 %v1549_v0 }
 0x2ab   :  { %1330 = vmatpush3.msra.mxu0 %v1659_v14 }
 0x2ac   :  { %1331 = vmatprep.subr.mxu0 %v1549_v0 }
 0x2ad   :  { %1332 = vmatpush3.msra.mxu0 %v1665_v15 }
 0x2ae   :  { %1333 = vmatprep.subr.mxu0 %v1549_v0 }
 0x2af   :  { %1334 = vmatpush3.msra.mxu0 %v1671_v16 }
 0x2b0   :  { %1335 = vmatprep.subr.mxu0 %v1549_v0 }
 0x2b1   :  { %1336 = vmatpush3.msra.mxu0 %v1677_v17 }
 0x2b2   :  { %1337 = vmatprep.subr.mxu0 %v1549_v0 }
 0x2b3   :  { %1338 = vmatpush3.msra.mxu0 %v1683_v18 }
 0x2b4   :  { %1339 = vmatprep.subr.mxu0 %v1549_v0 }
 0x2b5   :  { %1340 = vmatpush3.msra.mxu0 %v1689_v19 }
 0x2b6   :  { %1379 = vmatprep.subr.mxu0 %v1549_v0 }
 0x356   :  { %v485_v49 = vpop.f32.mrf.mxu0 }
 0x357   :  { %v490_v50 = vrot.slane %v485_v49, 5  ;;  %v491_v51 = vrot.slane %v485_v49, 6 }
 0x358   :  { %v1273_v52 = vpop.f32.mrf.mxu0 }
 0x359   :  { %v494_v53 = vadd.f32 %v490_v50, %v1750_v26  ;;  %v495_v54 = vadd.f32 %v491_v51, %v1748_v24 }
 0x35b   :  { %v498_v55 = vrot.slane %v494_v53, 3  ;;  %v499_v56 = vrot.slane %v495_v54, 2 }
 0x35d   :  { %v500_v57 = vsel %vm252_vm3, %v499_v56, %v498_v55 }
 0x35e   :  { %1307 = vmatmul.mubr.f32.vlgmr.msra.gmra.mxu1 %v500_v57 }
 0x35f   :  { %1345 = vmatpush3.msra.mxu1 %v1603_v1  ;;  %1376 = vmatprep.mubr.msk.f32.mxu1 %vm1550_vm0, %v1549_v0 }
 0x360   :  { %1346 = vmatprep.subr.mxu1 %v1549_v0 }
 0x361   :  { %1347 = vmatpush3.msra.mxu1 %v1605_v2 }
 0x362   :  { %1348 = vmatprep.subr.mxu1 %v1549_v0 }
 0x363   :  { %1349 = vmatpush3.msra.mxu1 %v1609_v3 }
 0x364   :  { %1350 = vmatprep.subr.mxu1 %v1549_v0 }
 0x365   :  { %1351 = vmatpush3.msra.mxu1 %v1613_v4 }
 0x366   :  { %1352 = vmatprep.subr.mxu1 %v1549_v0 }
 0x367   :  { %1353 = vmatpush3.msra.mxu1 %v1626_v8 }
 0x368   :  { %1354 = vmatprep.subr.mxu1 %v1549_v0 }
 0x369   :  { %1355 = vmatpush3.msra.mxu1 %v1630_v9 }
 0x36a   :  { %1356 = vmatprep.subr.mxu1 %v1549_v0 }
 0x36b   :  { %1357 = vmatpush3.msra.mxu1 %v1635_v10 }
 0x36c   :  { %1358 = vmatprep.subr.mxu1 %v1549_v0 }
 0x36d   :  { %1359 = vmatpush3.msra.mxu1 %v1641_v11 }
 0x36e   :  { %1360 = vmatprep.subr.mxu1 %v1549_v0 }
 0x36f   :  { %1361 = vmatpush3.msra.mxu1 %v1647_v12 }
 0x370   :  { %1362 = vmatprep.subr.mxu1 %v1549_v0 }
 0x371   :  { %1363 = vmatpush3.msra.mxu1 %v1653_v13 }
 0x372   :  { %1364 = vmatprep.subr.mxu1 %v1549_v0 }
 0x373   :  { %1365 = vmatpush3.msra.mxu1 %v1659_v14 }
 0x374   :  { %1366 = vmatprep.subr.mxu1 %v1549_v0 }
 0x375   :  { %1367 = vmatpush3.msra.mxu1 %v1665_v15 }
 0x376   :  { %1368 = vmatprep.subr.mxu1 %v1549_v0 }
 0x377   :  { %1369 = vmatpush3.msra.mxu1 %v1671_v16 }
 0x378   :  { %1370 = vmatprep.subr.mxu1 %v1549_v0 }
 0x379   :  { %1371 = vmatpush3.msra.mxu1 %v1677_v17 }
 0x37a   :  { %1372 = vmatprep.subr.mxu1 %v1549_v0 }
 0x37b   :  { %1373 = vmatpush3.msra.mxu1 %v1683_v18 }
 0x37c   :  { %1374 = vmatprep.subr.mxu1 %v1549_v0 }
 0x37d   :  { %1375 = vmatpush3.msra.mxu1 %v1689_v19 }
 0x37e   :  { %1414 = vmatprep.subr.mxu1 %v1549_v0 }
 0x41e   :  { %v568_v58 = vpop.f32.mrf.mxu1 }
 0x41f   :  { %v573_v59 = vrot.slane %v568_v58, 4  ;;  %v574_v60 = vrot.slane %v568_v58, 5 }
 0x420   :  { %v1308_v61 = vpop.f32.mrf.mxu1 }
 0x421   :  { %v577_v62 = vadd.f32 %v573_v59, %v1750_v26  ;;  %v578_v63 = vadd.f32 %v574_v60, %v1748_v24 }
 0x423   :  { %v581_v5 = vrot.slane %v577_v62, 4  ;;  %v582_v6 = vrot.slane %v578_v63, 3 }
 0x425   :  { %v583_v7 = vsel %vm252_vm3, %v582_v6, %v581_v5 }
 0x426   :  { %1342 = vmatmul.mubr.f32.vlgmr.msra.gmra.mxu0 %v583_v7 }
 0x427   :  { %1380 = vmatpush3.msra.mxu0 %v1603_v1  ;;  %1411 = vmatprep.mubr.msk.f32.mxu0 %vm1550_vm0, %v1549_v0 }
 0x428   :  { %1381 = vmatprep.subr.mxu0 %v1549_v0 }
 0x429   :  { %1382 = vmatpush3.msra.mxu0 %v1605_v2 }
 0x42a   :  { %1383 = vmatprep.subr.mxu0 %v1549_v0 }
 0x42b   :  { %1384 = vmatpush3.msra.mxu0 %v1609_v3 }
 0x42c   :  { %1385 = vmatprep.subr.mxu0 %v1549_v0 }
 0x42d   :  { %1386 = vmatpush3.msra.mxu0 %v1613_v4 }
 0x42e   :  { %1387 = vmatprep.subr.mxu0 %v1549_v0 }
 0x42f   :  { %1388 = vmatpush3.msra.mxu0 %v1626_v8 }
 0x430   :  { %1389 = vmatprep.subr.mxu0 %v1549_v0 }
 0x431   :  { %1390 = vmatpush3.msra.mxu0 %v1630_v9 }
 0x432   :  { %1391 = vmatprep.subr.mxu0 %v1549_v0 }
 0x433   :  { %1392 = vmatpush3.msra.mxu0 %v1635_v10 }
 0x434   :  { %1393 = vmatprep.subr.mxu0 %v1549_v0 }
 0x435   :  { %1394 = vmatpush3.msra.mxu0 %v1641_v11 }
 0x436   :  { %1395 = vmatprep.subr.mxu0 %v1549_v0 }
 0x437   :  { %1396 = vmatpush3.msra.mxu0 %v1647_v12 }
 0x438   :  { %1397 = vmatprep.subr.mxu0 %v1549_v0 }
 0x439   :  { %1398 = vmatpush3.msra.mxu0 %v1653_v13  ;;  %v855_v13 = vld [vmem:[#allocation6 + $0x78] sm:$0xff] }
 0x43a   :  { %1399 = vmatprep.subr.mxu0 %v1549_v0 }
 0x43b   :  { %1400 = vmatpush3.msra.mxu0 %v1659_v14  ;;  %v854_v14 = vld [vmem:[#allocation6 + $0x70] sm:$0xff] }
 0x43c   :  { %1401 = vmatprep.subr.mxu0 %v1549_v0 }
 0x43d   :  { %1402 = vmatpush3.msra.mxu0 %v1665_v15  ;;  %v853_v15 = vld [vmem:[#allocation6 + $0x68] sm:$0xff] }
 0x43e   :  { %1403 = vmatprep.subr.mxu0 %v1549_v0 }
 0x43f   :  { %1404 = vmatpush3.msra.mxu0 %v1671_v16  ;;  %v852_v16 = vld [vmem:[#allocation6 + $0x60] sm:$0xff] }
 0x440   :  { %1405 = vmatprep.subr.mxu0 %v1549_v0 }
 0x441   :  { %1406 = vmatpush3.msra.mxu0 %v1677_v17  ;;  %v851_v17 = vld [vmem:[#allocation6 + $0x58] sm:$0xff] }
 0x442   :  { %1407 = vmatprep.subr.mxu0 %v1549_v0 }
 0x443   :  { %1408 = vmatpush3.msra.mxu0 %v1683_v18  ;;  %v850_v18 = vld [vmem:[#allocation6 + $0x50] sm:$0xff] }
 0x444   :  { %1409 = vmatprep.subr.mxu0 %v1549_v0 }
 0x445   :  { %1410 = vmatpush3.msra.mxu0 %v1689_v19  ;;  %v849_v19 = vld [vmem:[#allocation6 + $0x48] sm:$0xff] }
 0x4e6   :  { %v651_v1 = vpop.f32.mrf.mxu0 }
 0x4e7   :  { %v656_v2 = vrot.slane %v651_v1, 3  ;;  %v657_v3 = vrot.slane %v651_v1, 4 }
 0x4e8   :  { %v1343_v4 = vpop.f32.mrf.mxu0 }
 0x4e9   :  { %v660_v8 = vadd.f32 %v656_v2, %v1750_v26  ;;  %v661_v9 = vadd.f32 %v657_v3, %v1748_v24 }
 0x4eb   :  { %v664_v10 = vrot.slane %v660_v8, 5  ;;  %v665_v11 = vrot.slane %v661_v9, 4 }
 0x4ed   :  { %v666_v12 = vsel %vm252_vm3, %v665_v11, %v664_v10 }
 0x4ee   :  { %1377 = vmatmul.mubr.f32.vlgmr.msra.gmra.mxu1 %v666_v12 }
 0x4ef   :  { %1446 = vmatprep.mubr.msk.f32.mxu1 %vm1550_vm0, %v1549_v0  ;;  %1415 = vmatpush3.msra.mxu1 %v855_v13 }
 0x4f0   :  { %1416 = vmatprep.subr.mxu1 %v1549_v0 }
 0x4f1   :  { %1417 = vmatpush3.msra.mxu1 %v854_v14 }
 0x4f2   :  { %1418 = vmatprep.subr.mxu1 %v1549_v0 }
 0x4f3   :  { %1419 = vmatpush3.msra.mxu1 %v853_v15 }
 0x4f4   :  { %1420 = vmatprep.subr.mxu1 %v1549_v0 }
 0x4f5   :  { %1421 = vmatpush3.msra.mxu1 %v852_v16 }
 0x4f6   :  { %1422 = vmatprep.subr.mxu1 %v1549_v0 }
 0x4f7   :  { %1423 = vmatpush3.msra.mxu1 %v851_v17 }
 0x4f8   :  { %1424 = vmatprep.subr.mxu1 %v1549_v0 }
 0x4f9   :  { %1425 = vmatpush3.msra.mxu1 %v850_v18 }
 0x4fa   :  { %1426 = vmatprep.subr.mxu1 %v1549_v0 }
 0x4fb   :  { %1427 = vmatpush3.msra.mxu1 %v849_v19 }
 0x4fc   :  { %1428 = vmatprep.subr.mxu1 %v1549_v0 }
 0x4fd   :  { %1429 = vmatpush3.msra.mxu1 %v848_v20 }
 0x4fe   :  { %1430 = vmatprep.subr.mxu1 %v1549_v0 }
 0x4ff   :  { %1431 = vmatpush3.msra.mxu1 %v847_v21 }
 0x500   :  { %1432 = vmatprep.subr.mxu1 %v1549_v0 }
 0x501   :  { %1433 = vmatpush3.msra.mxu1 %v846_v22 }
 0x502   :  { %1434 = vmatprep.subr.mxu1 %v1549_v0 }
 0x503   :  { %1435 = vmatpush3.msra.mxu1 %v845_v23 }
 0x504   :  { %1436 = vmatprep.subr.mxu1 %v1549_v0 }
 0x505   :  { %1437 = vmatpush3.msra.mxu1 %v844_v25 }
 0x506   :  { %1438 = vmatprep.subr.mxu1 %v1549_v0 }
 0x507   :  { %1439 = vmatpush3.msra.mxu1 %v843_v36 }
 0x508   :  { %1440 = vmatprep.subr.mxu1 %v1549_v0 }
 0x509   :  { %1441 = vmatpush3.msra.mxu1 %v842_v37 }
 0x50a   :  { %1442 = vmatprep.subr.mxu1 %v1549_v0 }
 0x50b   :  { %1443 = vmatpush3.msra.mxu1 %v841_v38 }
 0x50c   :  { %1444 = vmatprep.subr.mxu1 %v1549_v0 }
 0x50d   :  { %1445 = vmatpush3.msra.mxu1 %v840_v39 }
 0x5ae   :  { %v734_v27 = vpop.f32.mrf.mxu1 }
 0x5af   :  { %v739_v28 = vrot.slane %v734_v27, 2  ;;  %v740_v29 = vrot.slane %v734_v27, 3 }
 0x5b0   :  { %v1378_v30 = vpop.f32.mrf.mxu1 }
 0x5b1   :  { %v743_v31 = vadd.f32 %v739_v28, %v1750_v26  ;;  %v744_v32 = vadd.f32 %v740_v29, %v1748_v24 }
 0x5b3   :  { %v747_v33 = vrot.slane %v743_v31, 6  ;;  %v748_v34 = vrot.slane %v744_v32, 5 }
 0x5b5   :  { %v749_v35 = vsel %vm252_vm3, %v748_v34, %v747_v33 }
 0x5b6   :  { %1412 = vmatmul.mubr.f32.vlgmr.msra.gmra.mxu0 %v749_v35 }
 0x676   :  { %v817_v40 = vpop.f32.mrf.mxu0 }
 0x677   :  { %v822_v41 = vrot.slane %v817_v40, 1  ;;  %v823_v42 = vrot.slane %v817_v40, 2 }
 0x678   :  { %v1413_v43 = vpop.f32.mrf.mxu0 }
 0x679   :  { %v826_v44 = vadd.f32 %v822_v41, %v1750_v26  ;;  %v827_v45 = vadd.f32 %v823_v42, %v1748_v24 }
 0x67b   :  { %833 = vst [vmem:[#allocation2 - $0x7] sm:$0x80] %v826_v44  ;;  %v864_v46 = vrot.slane %v827_v45, 6  ;;  %838 = vst [vmem:[#allocation9 - $0x7] sm:$0x80] %v826_v44  ;;  %v863_v47 = vrot.slane %v826_v44, 7 }
 0x67c   :  { %v830_v48 = vrot.slane %v827_v45, 7 }
 0x67d   :  { %v865_v49 = vsel %vm252_vm3, %v864_v46, %v863_v47 }
 0x67e   :  { %834 = vst [vmem:[#allocation2 + $0x1] sm:$0x1] %v830_v48  ;;  %839 = vst [vmem:[#allocation9 + $0x1] sm:$0x1] %v830_v48  ;;  %1447 = vmatmul.mubr.f32.vlgmr.msra.gmra.mxu1 %v865_v49 }
 0x67f   :  { %1508 = shalt.err (!%p1505_p0)
}
 0x680   :  { %957 = dma.vmem_to_hbm [thread:$0]  %s955_s17, 32, %s1978_s7, [#allocation10]   ;;  %v972_v0 = vld [vmem:[%s1976_s5] ss:$0 sm:$0xff] }
 0x681   :  { %s1552_s23 = smov [#allocation8]  }
 0x682   :  { %s944_s24 = sshll.u32 %s1552_s23, 4  ;;  %s945_s24 = int_to_ptr.vmem [resolvable:$true] %s944_s24 }
 0x683   :  { %s1517_s25 = scalar_lea.vmem %s945_s24, 32  ;;  %p1522_p2 = scmp.lt.s32.totalorder %s945_s24, %s945_s24 }
 0x684   :  { %p1518_p1 = scmp.ne.s32.totalorder %s945_s24, %s1517_s25  ;;  %p1523_p3 = scmp.lt.s32.totalorder %s1517_s25, %s1517_s25 }
 0x686   :  { %p1524_p4 = por %p1523_p3, %p1522_p2 }
 0x688   :  { %p1525_p5 = pnand %p1524_p4, %p1518_p1 }
 0x73e   :  { %v933_v24 = vpop.f32.mrf.mxu1 }
 0x73f   :  { %v934_v26 = vadd.f32 %v972_v0, %v933_v24 }
 0x740   :  { %v1448_v50 = vpop.f32.mrf.mxu1 }
 0x741   :  { %937 = vst [vmem:[#allocation8] sm:$0x3] %v934_v26 }
 0x742   :  { %1528 = shalt.err (!%p1525_p5)
}
 0x743   :  { %947 = dma.vmem_to_hbm [thread:$0]  %s945_s24, 32, %s1977_s6, [#allocation5]  }
 0x744   :  { %1541 = dma.done.wait [#allocation5], 32  }
 0x745   :  { %1542 = vsyncadd [#allocation5], 4294967264 }
 0x746   :  { %1543 = dma.done.wait [#allocation10], 32  }
 0x747   :  { %1544 = vsyncadd [#allocation10], 4294967264 }
 0x748   :  { %964 = vsyncpa [#allocation4], 1 }
 0x749   :  { %965 = vsyncpa [#allocation7], 1 }
 0x74a   :  { %966 = vsyncpa [#allocation5], 1 }
 0x74b   :  { %967 = vsyncpa [#allocation10], 1 }

</bundles_post_ra>
